<compile_context>
chip_gen: v5e
topology: v5e:2x2
jax: 0.10.0
libtpu: 0.0.40
codegen_flags: <defaults>
</compile_context>

<pallas_src>
import math

import jax
import jax.numpy as jnp
from jax.experimental import pallas as pl
from jax.experimental.pallas import tpu as pltpu


def dense_attention_kernel(x_ref, mask_ref, inv_n_ref, w_ref, out_ref):
    # x_ref:     (TB, N, D)
    # mask_ref:  (TB, N)        dense 2-D mask tile
    # inv_n_ref: (TB, 1)        f32, 1 / num_valid_nodes
    # w_ref:     (D, D)
    # out_ref:   (TB, D)
    x = x_ref[...]
    m = mask_ref[...]
    inv_n = inv_n_ref[...]                                   # (TB, 1) f32

    # f32 accumulation of the node sum / mean (bf16-safe); the divide was
    # replaced by a broadcast multiply with the precomputed reciprocal.
    x_f32 = x.astype(jnp.float32)
    mean = jnp.sum(x_f32, axis=1) * inv_n                    # (TB, D) f32

    # The only real MXU matmul: a dense (TB, D) @ (D, D) tile.
    tg = jnp.tanh(jnp.dot(mean, w_ref[...].astype(jnp.float32),
                          preferred_element_type=jnp.float32))   # (TB, D)

    # scores[b, n] = <x[b, n, :], tg[b, :]>  as VPU broadcast-multiply +
    # cross-lane reduce over D.  Avoids TB skinny (1, D) MXU matmuls / RHS
    # staging and never relayouts the (N, D) x tile.  Everything downstream
    # stays sublane/lane dense (TB, N).
    scores = jnp.sum(x_f32 * tg[:, None, :], axis=2)         # (TB, N) f32
    koefs = jax.nn.sigmoid(scores) * m.astype(jnp.float32)   # mask folded in

    # out[b, :] = sum_n koefs[b, n] * x[b, n, :]  as VPU multiply + sublane
    # reduce over N on the already-resident x tile (no MXU staging).
    out = jnp.sum(koefs[:, :, None] * x_f32, axis=1)         # (TB, D) f32

    # TODO(synk): for D < 128 the (TB, D) store is a masked vst.msk; output
    # traffic is only 1/N of the x stream, so a lane-dense packed/padded
    # output slab is left out to keep the store path simple and portable.
    out_ref[...] = out.astype(out_ref.dtype)


def _vmem_budget_bytes():
    """Generation-aware scoped-VMEM budget for this pallas_call."""
    try:
        cap = pltpu.get_tpu_info().vmem_capacity_bytes
    except Exception:  # info unavailable (e.g. interpret mode) -> assume 128 MiB
        cap = 128 << 20
    if cap <= (64 << 20):      # v7x-class TensorCore: 64 MiB physical VMEM
        return 40 << 20
    return 64 << 20            # v5e / v6e: 128 MiB physical VMEM


def _choose_block_b(B, N, D, itemsize, vmem_budget_bytes, min_grid_steps=4):
    """Pick the per-step batch tile TB.

    Accounts for every resident VMEM consumer: the double-buffered x / mask /
    inv_n / out pipeline blocks, both pipeline copies of the (D, D) weight
    matrix, and the f32 intermediates the kernel materializes.  TB is also
    capped so the grid keeps >= `min_grid_steps` steps (when B allows), so
    v7x can shard steps across its two TensorCores and the DMA pipeline has
    work to overlap.  TB is either a multiple of 8 or the whole batch.
    """
    per_b = (2 * N * D * itemsize        # x block, double-buffered
             + 2 * N * itemsize          # mask block, double-buffered
             + 2 * 4                     # inv_num_nodes (f32), double-buffered
             + 2 * D * itemsize          # out block, double-buffered
             + 2 * N * D * 4             # f32 cast / weighted temporaries
             + 2 * N * 4                 # scores / koefs (f32)
             + 3 * D * 4)                # x_sum / mean / tg (f32)
    fixed = 2 * D * D * itemsize + (4 << 20)   # W pipeline copies + headroom
    avail = max(vmem_budget_bytes - fixed, per_b)
    tb = max(1, avail // per_b)
    # Never collapse to a single huge step: keep >= min_grid_steps grid steps.
    target = (((B + min_grid_steps - 1) // min_grid_steps) + 7) // 8 * 8
    tb = min(tb, max(8, target))
    if tb >= B:
        return B                          # single step over the (small) batch
    return max(8, (tb // 8) * 8)


def dense_attention_forward(x, w, mask=None, block_b=None):
    """x: (B, N, D), w: (D, D), mask: optional (B, N) float/bool."""
    B, N, D = x.shape
    if mask is None:
        # An all-ones mask reproduces the mask=None branch exactly
        # (mean == x.mean(axis=1), final mask multiply is identity).
        mask = jnp.ones((B, N), dtype=x.dtype)
    mask2d = mask.astype(x.dtype).reshape(B, N)

    # 1 / num_valid_nodes in f32, computed once in the wrapper (trivially
    # fused by XLA) so the kernel replaces a cross-lane reduce + divide with
    # a single broadcast multiply.  Matches torch: an all-zero real mask row
    # still yields inf/nan (stated precondition: >= 1 valid node per graph).
    inv_n = 1.0 / jnp.sum(mask2d.astype(jnp.float32), axis=1, keepdims=True)

    itemsize = jnp.dtype(x.dtype).itemsize
    budget = _vmem_budget_bytes()
    tb = block_b if block_b is not None else _choose_block_b(
        B, N, D, itemsize, budget)

    b_pad = pl.cdiv(B, tb) * tb
    if b_pad != B:
        x = jnp.pad(x, ((0, b_pad - B), (0, 0), (0, 0)))
        # Padded rows get an all-ones mask / finite 1/N reciprocal so they
        # never produce inf/nan (their outputs are sliced away below).
        mask2d = jnp.pad(mask2d, ((0, b_pad - B), (0, 0)), constant_values=1.0)
        inv_n = jnp.pad(inv_n, ((0, b_pad - B), (0, 0)),
                        constant_values=1.0 / N)

    # TODO(synk): for very large N where a (TB, N, D) block no longer fits
    # VMEM, add an inner N-tiled two-pass variant (accumulate sum, then
    # re-stream x for scores + weighted sum).
    out = pl.pallas_call(
        dense_attention_kernel,
        out_shape=jax.ShapeDtypeStruct((b_pad, D), x.dtype),
        grid_spec=pltpu.PrefetchScalarGridSpec(
            num_scalar_prefetch=0,
            grid=(b_pad // tb,),
            in_specs=[
                pl.BlockSpec((tb, N, D), lambda b: (b, 0, 0)),   # x
                pl.BlockSpec((tb, N), lambda b: (b, 0)),         # mask (dense 2-D)
                pl.BlockSpec((tb, 1), lambda b: (b, 0)),         # 1/num_nodes
                pl.BlockSpec((D, D), lambda b: (0, 0)),          # weight matrix
            ],
            out_specs=pl.BlockSpec((tb, D), lambda b: (b, 0)),
        ),
        compiler_params=pltpu.CompilerParams(
            dimension_semantics=("parallel",),
            vmem_limit_bytes=budget),
    )(x, mask2d, inv_n, w)
    return out[:B]


def dense_attention_ref(x, w, mask=None):
    """Pure-JAX reference mirroring the PyTorch forward."""
    B, N, D = x.shape
    if mask is not None:
        num_nodes = mask.reshape(B, N).sum(axis=1, keepdims=True)
        mean = x.sum(axis=1) / num_nodes.astype(x.dtype)
    else:
        mean = x.mean(axis=1)
    tg = jnp.tanh(mean @ w)                                   # (B, D)
    koefs = jax.nn.sigmoid(jnp.einsum("bnd,bd->bn", x, tg))   # (B, N)
    weighted = koefs[..., None] * x
    if mask is not None:
        weighted = weighted * mask.reshape(B, N, 1).astype(x.dtype)
    return weighted.sum(axis=1)


if __name__ == "__main__":
    key = jax.random.PRNGKey(0)
    B, N, D = 2, 8, 32

    kx, kw, km = jax.random.split(key, 3)
    x = jax.random.normal(kx, (B, N, D), dtype=jnp.float32)

    # Deterministic Xavier-uniform init for the (D, D) weight matrix.
    limit = math.sqrt(6.0 / (D + D))
    w = jax.random.uniform(kw, (D, D), dtype=jnp.float32,
                           minval=-limit, maxval=limit)

    # Prefix mask; zero-out invalid node features (as a GNN pipeline would).
    valid = jnp.array([6, 8], dtype=jnp.int32)
    mask = (jnp.arange(N)[None, :] < valid[:, None]).astype(jnp.float32)  # (B, N)
    x = x * mask[..., None]

    out = jax.block_until_ready(dense_attention_forward(x, w, mask))
    ref = dense_attention_ref(x, w, mask)
    assert out.shape == (B, D)
    assert jnp.allclose(out, ref, atol=1e-5, rtol=1e-5), (out, ref)

    # mask=None path.
    out_nomask = jax.block_until_ready(dense_attention_forward(x, w, None))
    ref_nomask = dense_attention_ref(x, w, None)
    assert jnp.allclose(out_nomask, ref_nomask, atol=1e-5, rtol=1e-5)

    # Multi-grid-step + batch-padding path (TB=8, B=20 -> B_pad=24, 3 steps).
    B2 = 20
    kx2, km2 = jax.random.split(km)
    x2 = jax.random.normal(kx2, (B2, N, D), dtype=jnp.float32)
    valid2 = jax.random.randint(km2, (B2,), 1, N + 1)
    mask2 = (jnp.arange(N)[None, :] < valid2[:, None]).astype(jnp.float32)
    x2 = x2 * mask2[..., None]
    out2 = jax.block_until_ready(dense_attention_forward(x2, w, mask2, block_b=8))
    ref2 = dense_attention_ref(x2, w, mask2)
    assert out2.shape == (B2, D)
    assert jnp.allclose(out2, ref2, atol=1e-5, rtol=1e-5), (out2, ref2)

    # Automatic block chooser picks the same multi-step tiling for B=20.
    assert _choose_block_b(B2, N, D, 4, _vmem_budget_bytes()) == 8

    print("KERNEL_OK")
</pallas_src>

<mosaic_0001>
module attributes {stable_mosaic.version = 11 : i64} {
  func.func @dense_attention_kernel(%arg0: i32, %arg1: memref<2x8x32xf32, #tpu.memory_space<vmem>>, %arg2: memref<2x8xf32, #tpu.memory_space<vmem>>, %arg3: memref<2x1xf32, #tpu.memory_space<vmem>>, %arg4: memref<32x32xf32, #tpu.memory_space<vmem>>, %arg5: memref<2x32xf32, #tpu.memory_space<vmem>>) attributes {dimension_semantics = [#tpu.dimension_semantics<parallel>], iteration_bounds = array<i64: 1>, scalar_prefetch = 0 : i64, scratch_operands = 0 : i64, tpu.core_type = #tpu.core_type<tc>, window_params = [{transform_indices = @transform_0, window_bounds = array<i64: 2, 8, 32>}, {transform_indices = @transform_1, window_bounds = array<i64: 2, 8>}, {transform_indices = @transform_2, window_bounds = array<i64: 2, 1>}, {pipeline_mode = #tpu.pipeline_mode<synchronous>, transform_indices = @transform_3, window_bounds = array<i64: 32, 32>}, {transform_indices = @transform_4, window_bounds = array<i64: 2, 32>}]} {
    %c0 = arith.constant 0 : index
    %c0_0 = arith.constant 0 : index
    %c0_1 = arith.constant 0 : index
    %0 = vector.load %arg1[%c0, %c0_0, %c0_1] : memref<2x8x32xf32, #tpu.memory_space<vmem>>, vector<2x8x32xf32>
    %c0_2 = arith.constant 0 : index
    %c0_3 = arith.constant 0 : index
    %1 = vector.load %arg2[%c0_2, %c0_3] : memref<2x8xf32, #tpu.memory_space<vmem>>, vector<2x8xf32>
    %c0_4 = arith.constant 0 : index
    %c0_5 = arith.constant 0 : index
    %2 = vector.load %arg3[%c0_4, %c0_5] : memref<2x1xf32, #tpu.memory_space<vmem>>, vector<2x1xf32>
    %cst = arith.constant dense<0.000000e+00> : vector<2x32xf32>
    %3 = vector.multi_reduction <add>, %0, %cst [1] : vector<2x8x32xf32> to vector<2x32xf32>
    %4 = vector.broadcast %2 : vector<2x1xf32> to vector<2x32xf32>
    %5 = arith.mulf %3, %4 : vector<2x32xf32>
    %c0_6 = arith.constant 0 : index
    %c0_7 = arith.constant 0 : index
    %6 = vector.load %arg4[%c0_6, %c0_7] : memref<32x32xf32, #tpu.memory_space<vmem>>, vector<32x32xf32>
    %cst_8 = arith.constant dense<0.000000e+00> : vector<2x32xf32>
    %7 = tpu.matmul %5, %6, %cst_8 {dimension_numbers = #tpu.dot_dimension_numbers<[1], [0], [0], [1], [0, 0, 1, 1], [], []>} : vector<2x32xf32>, vector<32x32xf32>, vector<2x32xf32> -> vector<2x32xf32>
    %8 = math.tanh %7 : vector<2x32xf32>
    %9 = vector.shape_cast %8 : vector<2x32xf32> to vector<2x1x32xf32>
    %10 = vector.broadcast %9 : vector<2x1x32xf32> to vector<2x8x32xf32>
    %11 = arith.mulf %0, %10 : vector<2x8x32xf32>
    %cst_9 = arith.constant dense<0.000000e+00> : vector<2x8xf32>
    %12 = vector.multi_reduction <add>, %11, %cst_9 [2] : vector<2x8x32xf32> to vector<2x8xf32>
    %13 = arith.negf %12 : vector<2x8xf32>
    %14 = math.exp %13 : vector<2x8xf32>
    %cst_10 = arith.constant 1.000000e+00 : f32
    %15 = vector.broadcast %cst_10 : f32 to vector<2x8xf32>
    %16 = arith.addf %15, %14 : vector<2x8xf32>
    %17 = arith.divf %15, %16 : vector<2x8xf32>
    %18 = arith.mulf %17, %1 : vector<2x8xf32>
    %19 = vector.shape_cast %18 : vector<2x8xf32> to vector<2x8x1xf32>
    %20 = vector.broadcast %19 : vector<2x8x1xf32> to vector<2x8x32xf32>
    %21 = arith.mulf %20, %0 : vector<2x8x32xf32>
    %cst_11 = arith.constant dense<0.000000e+00> : vector<2x32xf32>
    %22 = vector.multi_reduction <add>, %21, %cst_11 [1] : vector<2x8x32xf32> to vector<2x32xf32>
    %c0_12 = arith.constant 0 : index
    %c0_13 = arith.constant 0 : index
    %23 = vector.load %arg5[%c0_12, %c0_13] : memref<2x32xf32, #tpu.memory_space<vmem>>, vector<2x32xf32>
    tpu.vector_store %arg5[%c0_12, %c0_13], %22 {strides = array<i32>} : memref<2x32xf32, #tpu.memory_space<vmem>>, vector<2x32xf32>,
    return
  }
  func.func @transform_0(%arg0: i32) -> (i32, i32, i32) {
    %c0_i32 = arith.constant 0 : i32
    %c0_i32_0 = arith.constant 0 : i32
    %c0_i32_1 = arith.constant 0 : i32
    return %arg0, %c0_i32, %c0_i32_0 : i32, i32, i32
  }
  func.func @transform_1(%arg0: i32) -> (i32, i32) {
    %c0_i32 = arith.constant 0 : i32
    %c0_i32_0 = arith.constant 0 : i32
    return %arg0, %c0_i32 : i32, i32
  }
  func.func @transform_2(%arg0: i32) -> (i32, i32) {
    %c0_i32 = arith.constant 0 : i32
    %c0_i32_0 = arith.constant 0 : i32
    return %arg0, %c0_i32 : i32, i32
  }
  func.func @transform_3(%arg0: i32) -> (i32, i32) {
    %c0_i32 = arith.constant 0 : i32
    %c0_i32_0 = arith.constant 0 : i32
    %c0_i32_1 = arith.constant 0 : i32
    return %c0_i32, %c0_i32_0 : i32, i32
  }
  func.func @transform_4(%arg0: i32) -> (i32, i32) {
    %c0_i32 = arith.constant 0 : i32
    %c0_i32_0 = arith.constant 0 : i32
    return %arg0, %c0_i32 : i32, i32
  }
}

</mosaic_0001>

<bundles_post_ra>
// kernel: tpu_custom_call.1
= control target key start
LH: loop header
LB: loop body
LE: loop exit
PB: predicated region body
PF: predicated region fallthrough
CT: control target
= control target key end

     0   :  { %9 = vsyncpa [#allocation3], 0  ;;  %s397_s0 = inlined_call_operand.hbm [shape: f32[2,8,32], index: 0, kind: input, shape index: {}]   ;;  %s398_s1 = inlined_call_operand.vmem [shape: f32[2,8], index: 1, kind: input, shape index: {}]   ;;  %s399_s2 = inlined_call_operand.vmem [shape: f32[2,1], index: 2, kind: input, shape index: {}]   ;;  %s400_s3 = inlined_call_operand.hbm [shape: f32[32,32], index: 3, kind: input, shape index: {}]   ;;  %s401_s4 = inlined_call_operand.hbm [shape: f32[2,32], index: 4, kind: output, shape index: {}]  }
   0x1   :  { %10 = vsyncpa [#allocation6], 0 }
   0x2   :  { %11 = vsyncpa [#allocation4], 0  ;;  %s16_s17 = sshll.u32 %s397_s0, 4  ;;  %s332_s18 = smov [#allocation2]   ;;  %s17_s17 = int_to_ptr.hbm [resolvable:$true] %s16_s17 }
   0x3   :  { %s18_s19 = sshll.u32 %s332_s18, 4  ;;  %s33_s22 = sshll.u32 %s400_s3, 4  ;;  %s19_s19 = int_to_ptr.vmem [resolvable:$true] %s18_s19  ;;  %s34_s22 = int_to_ptr.hbm [resolvable:$true] %s33_s22 }
   0x4   :  { %s333_s23 = smov 128   ;;  %s334_s24 = smov 8  }
   0x5   :  { %24 = dma.hbm_to_vmem [thread:$0]  %s17_s17, 256, %s19_s19, [#allocation3], %s333_s23, %s333_s23, %s334_s24  }
   0x6   :  { %s335_s25 = smov [#allocation5]  }
   0x7   :  { %s35_s26 = sshll.u32 %s335_s25, 4  ;;  %s36_s26 = int_to_ptr.vmem [resolvable:$true] %s35_s26 }
   0x8   :  { %41 = dma.hbm_to_vmem [thread:$0]  %s34_s22, 512, %s36_s26, [#allocation6], %s333_s23, %s333_s23, %s334_s24  }
   0x9   :  { %326 = dma.done.wait [#allocation3], 256  }
   0xa   :  { %327 = vsyncadd [#allocation3], 4294967040 }
   0xb   :  { %328 = dma.done.wait [#allocation6], 512  }
   0xc   :  { %329 = vsyncadd [#allocation6], 4294966784  ;;  %v336_v0 = vmov 0   ;;  %v53_v1 = vld [vmem:[%s399_s2] sm:$0x3]  ;;  %v81_v2 = vld [vmem:[#allocation5 + $0x18] sm:$0xff]  ;;  %v164_v28 = vlaneseq }
   0xd   :  { %240 = vset.pattern.permute.xlu0 %v336_v0  ;;  %101 = vmatpush.msra.mxu0 %v81_v2  ;;  %v80_v3 = vld [vmem:[#allocation5 + $0x10] sm:$0xff]  ;;  %v79_v4 = vld [vmem:[#allocation5 + $0x8] sm:$0xff]  ;;  %v372_v5 = vld [vmem:[#allocation2 + $0x8] sm:$0xff]  ;;  %vm54_vm0 = vcmask 261120   ;;  %vm85_vm1 = vcmask 1041409   ;;  %s220_s5 = sshll.u32 %s401_s4, 4  ;;  %s221_s5 = int_to_ptr.hbm [resolvable:$true] %s220_s5 }
   0xe   :  { %71 = vperm.xlu0 %240, %v53_v1   ;;  %v78_v6 = vld [vmem:[#allocation5] sm:$0xff]  ;;  %v374_v7 = vld [vmem:[#allocation2] sm:$0xff]  ;;  %v62_v8 = vsel %vm54_vm0, %v372_v5, 0.0  ;;  %v165_v29 = vshrl.u32 %v164_v28, 7  ;;  %vm211_vm10 = vcmask 254976  }
   0xf   :  { %102 = vmatpush.msra.mxu0 %v80_v3  ;;  %v55_v9 = vsel %vm54_vm0, %v374_v7, 0.0  ;;  %v63_v10 = vrot.slane %v62_v8, 4  ;;  %v52_v32 = vld [vmem:[%s398_s1] sm:$0x3]  ;;  %s337_s1 = smov [#allocation7]  }
  0x10   :  { %v56_v11 = vrot.slane %v55_v9, 4  ;;  %241 = vset.pattern.permute.xlu1 %v165_v29  ;;  %242 = vset.pattern.permute.xlu2 %v165_v29  ;;  %v170_v35 = vperm.slane %v52_v32, 1  ;;  %v163_v41 = vperm.slane %v52_v32, 0  ;;  %s218_s28 = sshll.u32 %s337_s1, 4  ;;  %s219_s28 = int_to_ptr.vmem [resolvable:$true] %s218_s28 }
  0x11   :  { %103 = vmatpush.msra.mxu0 %v79_v4  ;;  %v64_v12 = vadd.f32 %v63_v10, %v62_v8 }
  0x12   :  { %v57_v13 = vadd.f32 %v56_v11, %v55_v9 }
  0x13   :  { %104 = vmatpush.msra.mxu0 %v78_v6  ;;  %v65_v14 = vrot.slane %v64_v12, 2 }
  0x14   :  { %v58_v15 = vrot.slane %v57_v13, 2 }
  0x15   :  { %v66_v16 = vadd.f32 %v65_v14, %v64_v12 }
  0x16   :  { %v59_v17 = vadd.f32 %v58_v15, %v57_v13 }
  0x17   :  { %v67_v18 = vrot.slane %v66_v16, 1 }
  0x18   :  { %v60_v19 = vrot.slane %v59_v17, 1  ;;  %175 = vperm.xlu2 %242, %v170_v35  }
  0x19   :  { %v68_v20 = vadd.f32 %v67_v18, %v66_v16 }
  0x1a   :  { %v61_v22 = vadd.f32 %v60_v19, %v59_v17 }
  0x20   :  { %243 = vset.pattern.permute.xlu2 %v336_v0 }
  0x72   :  { %v176_v9 = vpop.permute.xlu2 %175 }
  0x80   :  { %v72_v21 = vpop.permute.xlu0 %71 }
  0x81   :  { %v73_v23 = vrot.slane %v72_v21, 1  ;;  %v76_v25 = vmul.f32 %v72_v21, %v61_v22 }
  0x83   :  { %v77_v24 = vmul.f32 %v73_v23, %v68_v20 }
  0x85   :  { %v84_v26 = vrot.slane %v77_v24, 7 }
  0x87   :  { %v86_v27 = vsel %vm85_vm1, %v84_v26, %v76_v25 }
  0x88   :  { %231 = vmatmul.msk.f32.vlgmr.msra.gmra.mxu0 %vm54_vm0, %v86_v27 }
 0x105   :  { %v106_v30 = vpop.f32.mrf.mxu0 }
 0x106   :  { %244 = vtanh.f32 %v106_v30 }
 0x10c   :  { %v245_v31 = vpop.eup %244 }
 0x10d   :  { %v112_v33 = vperm.slane %v245_v31, 0  ;;  %v111_v34 = vrot.slane %v245_v31, 1 }
 0x10f   :  { %v116_v36 = vmul.f32 %v112_v33, %v374_v7  ;;  %v113_v37 = vperm.slane %v111_v34, 0 }
 0x111   :  { %v118_v38 = vsel %vm54_vm0, %v116_v36, 0.0  ;;  %v117_v39 = vmul.f32 %v113_v37, %v372_v5 }
 0x112   :  { %119 = vadd.xlane.f32.xlu0 %v118_v38 }
 0x113   :  { %v121_v40 = vsel %vm54_vm0, %v117_v39, 0.0 }
 0x114   :  { %122 = vadd.xlane.f32.xlu1 %v121_v40 }
 0x12d   :  { %168 = vperm.xlu1 %241, %v163_v41  }
 0x185   :  { %v120_v42 = vpop.xlane.xlu0 %119 }
 0x186   :  { %v232_v43 = vmul.f32 -1.442695, %v120_v42 }
 0x187   :  { %v123_v44 = vpop.xlane.xlu1 %122 }
 0x188   :  { %246 = vpow2.f32 %v232_v43  ;;  %v233_v45 = vmul.f32 -1.442695, %v123_v44 }
 0x18a   :  { %248 = vpow2.f32 %v233_v45 }
 0x18e   :  { %v247_v46 = vpop.eup %246 }
 0x18f   :  { %v130_v47 = vadd.f32 1.0, %v247_v46 }
 0x190   :  { %v249_v48 = vpop.eup %248 }
 0x191   :  { %250 = vrcp.f32 %v130_v47  ;;  %v131_v49 = vadd.f32 1.0, %v249_v48  ;;  %v143_v55 = vand.u32 2147483648, %v130_v47  ;;  %v141_v57 = vand.u32 2147483647, %v130_v47 }
 0x192   :  { %vm137_vm3 = vweird.f32 %v130_v47 }
 0x193   :  { %252 = vrcp.f32 %v131_v49  ;;  %v144_v61 = vor.u32 1.1754944e-38, %v143_v55  ;;  %vm142_vm5 = vcmp.eq.f32.partialorder %v141_v57, 8.507059e+37  ;;  %v158_v2 = vand.u32 2147483648, %v131_v49 }
 0x194   :  { %vm152_vm7 = vweird.f32 %v131_v49  ;;  %v156_v4 = vand.u32 2147483647, %v131_v49 }
 0x195   :  { %v159_v8 = vor.u32 1.1754944e-38, %v158_v2 }
 0x196   :  { %vm157_vm9 = vcmp.eq.f32.partialorder %v156_v4, 8.507059e+37 }
 0x197   :  { %v251_v50 = vpop.eup %250 }
 0x198   :  { %v133_v51 = vmul.f32 %v251_v50, %v130_v47  ;;  %vm138_vm2 = vweird.f32 %v251_v50 }
 0x199   :  { %v253_v52 = vpop.eup %252  ;;  %vm139_vm4 = vmor %vm137_vm3, %vm138_vm2 }
 0x19a   :  { %v134_v53 = vsub.f32 1.0, %v133_v51  ;;  %v148_v54 = vmul.f32 %v253_v52, %v131_v49  ;;  %vm153_vm6 = vweird.f32 %v253_v52 }
 0x19b   :  { %vm154_vm8 = vmor %vm152_vm7, %vm153_vm6 }
 0x19c   :  { %v135_v56 = vmul.f32 %v251_v50, %v134_v53  ;;  %v149_v58 = vsub.f32 1.0, %v148_v54 }
 0x19e   :  { %v136_v59 = vadd.f32 %v251_v50, %v135_v56  ;;  %v150_v60 = vmul.f32 %v253_v52, %v149_v58 }
 0x19f   :  { %v169_v62 = vpop.permute.xlu1 %168 }
 0x1a0   :  { %v140_v63 = vsel %vm139_vm4, %v251_v50, %v136_v59  ;;  %v151_v0 = vadd.f32 %v253_v52, %v150_v60 }
 0x1a1   :  { %v145_v1 = vsel %vm142_vm5, %v144_v61, %v140_v63 }
 0x1a2   :  { %v179_v3 = vmul.f32 %v169_v62, %v145_v1  ;;  %v155_v6 = vsel %vm154_vm8, %v253_v52, %v151_v0 }
 0x1a3   :  { %v160_v10 = vsel %vm157_vm9, %v159_v8, %v155_v6 }
 0x1a4   :  { %183 = vperm.xlu2 %243, %v179_v3   ;;  %v180_v11 = vmul.f32 %v176_v9, %v160_v10 }
 0x1ac   :  { %188 = vperm.xlu2 %243, %v180_v11  }
 0x1fe   :  { %v184_v12 = vpop.permute.xlu2 %183 }
 0x1ff   :  { %v191_v13 = vmul.f32 %v184_v12, %v374_v7 }
 0x201   :  { %v193_v14 = vsel %vm54_vm0, %v191_v13, 0.0 }
 0x202   :  { %v194_v15 = vrot.slane %v193_v14, 4 }
 0x204   :  { %v195_v16 = vadd.f32 %v194_v15, %v193_v14 }
 0x206   :  { %v189_v17 = vpop.permute.xlu2 %188  ;;  %v196_v19 = vrot.slane %v195_v16, 2 }
 0x207   :  { %v192_v18 = vmul.f32 %v189_v17, %v372_v5 }
 0x208   :  { %v197_v22 = vadd.f32 %v196_v19, %v195_v16 }
 0x209   :  { %v200_v20 = vsel %vm54_vm0, %v192_v18, 0.0 }
 0x20a   :  { %v201_v21 = vrot.slane %v200_v20, 4  ;;  %v198_v25 = vrot.slane %v197_v22, 1 }
 0x20c   :  { %v202_v23 = vadd.f32 %v201_v21, %v200_v20  ;;  %v199_v7 = vadd.f32 %v198_v25, %v197_v22 }
 0x20e   :  { %v203_v24 = vrot.slane %v202_v23, 2 }
 0x210   :  { %v204_v26 = vadd.f32 %v203_v24, %v202_v23 }
 0x212   :  { %v205_v27 = vrot.slane %v204_v26, 1 }
 0x214   :  { %v206_v28 = vadd.f32 %v205_v27, %v204_v26 }
 0x216   :  { %v209_v5 = vsel %vm85_vm1, %v206_v28, %v199_v7 }
 0x217   :  { %212 = vst.msk [vmem:[#allocation7] sm:$0x3] %vm211_vm10, %v209_v5 }
 0x218   :  { %223 = dma.vmem_to_hbm [thread:$0]  %s219_s28, 32, %s221_s5, [#allocation4]  }
 0x219   :  { %330 = dma.done.wait [#allocation4], 32  }
 0x21a   :  { %331 = vsyncadd [#allocation4], 4294967264 }
 0x21b   :  { %228 = vsyncpa [#allocation3], 1 }
 0x21c   :  { %229 = vsyncpa [#allocation6], 1 }
 0x21d   :  { %230 = vsyncpa [#allocation4], 1 }

</bundles_post_ra>
